<compile_context>
chip_gen: v5e
topology: v5e:2x2
jax: 0.10.0
libtpu: 0.0.40
codegen_flags: <defaults>
</compile_context>

<pallas_src>
import functools

import jax
import jax.numpy as jnp
from jax.experimental import pallas as pl
from jax.experimental.pallas import tpu as pltpu


def _round_up(x, m):
    return (x + m - 1) // m * m


def _agg_t_kernel(feat_ref, adj_ref, out_ref, *, apply_relu):
    """Single-K-step: out[H, tile_m] = feat_T[H, K] · adj[tile_m, K]^T (opt. ReLU)."""
    res = jax.lax.dot_general(
        feat_ref[...], adj_ref[...],
        dimension_numbers=(((1,), (1,)), ((), ())),
        preferred_element_type=jnp.float32,
    )
    if apply_relu:
        res = jnp.maximum(res, 0.0)
    out_ref[...] = res.astype(out_ref.dtype)


def _agg_t_acc_kernel(feat_ref, adj_ref, out_ref, acc_ref, *, apply_relu, tile_k):
    """Split-K: accumulate out[H, tile_m] over K blocks in an f32 VMEM scratch."""
    k = pl.program_id(1)

    @pl.when(k == 0)
    def _():
        acc_ref[...] = jnp.zeros_like(acc_ref)

    start = pl.multiple_of(k * tile_k, 128)
    feat_blk = feat_ref[:, pl.ds(start, tile_k)]  # resident features, sliced in VMEM
    acc_ref[...] += jax.lax.dot_general(
        feat_blk, adj_ref[...],
        dimension_numbers=(((1,), (1,)), ((), ())),
        preferred_element_type=jnp.float32,
    )

    @pl.when(k == pl.num_programs(1) - 1)
    def _():
        res = acc_ref[...]
        if apply_relu:
            res = jnp.maximum(res, 0.0)
        out_ref[...] = res.astype(out_ref.dtype)


def _vmem_limit(tile_m, tile_k, n_pad, h, k_steps):
    adj_buf = 2 * tile_m * tile_k * 2      # double-buffered bf16 adj slab
    feat_buf = 2 * h * n_pad * 2           # resident bf16 features
    out_buf = 2 * h * tile_m * 4           # double-buffered output block (<= f32)
    acc = (h * tile_m * 4) if k_steps > 1 else 0
    need = adj_buf + feat_buf + out_buf + acc + (4 << 20)
    return int(min(max(need, 32 << 20), 64 << 20))


def gcn_aggregate_t(adj_p, feat_t, *, apply_relu, tile_m, tile_k,
                    out_dtype=jnp.float32):
    """Transposed aggregation: returns (adj_p @ feat_t.T).T as [H, n_pad].

    adj_p:  [n_pad, n_pad] bf16 (already padded/cast once by the caller).
    feat_t: [H, n_pad]     bf16 (N on the lane axis).
    """
    n_pad = adj_p.shape[0]
    h = feat_t.shape[0]
    rows = n_pad // tile_m
    k_steps = n_pad // tile_k
    out_shape = jax.ShapeDtypeStruct((h, n_pad), out_dtype)

    if k_steps == 1:
        grid = (rows,)
        kernel = functools.partial(_agg_t_kernel, apply_relu=apply_relu)
        in_specs = [
            pl.BlockSpec((h, n_pad), lambda m: (0, 0)),       # features: VMEM-resident
            pl.BlockSpec((tile_m, n_pad), lambda m: (m, 0)),  # adj row slab (full K)
        ]
        out_specs = pl.BlockSpec((h, tile_m), lambda m: (0, m))
        scratch = []
        dims = ("parallel",)
    else:
        grid = (rows, k_steps)
        kernel = functools.partial(
            _agg_t_acc_kernel, apply_relu=apply_relu, tile_k=tile_k)
        in_specs = [
            pl.BlockSpec((h, n_pad), lambda m, k: (0, 0)),       # resident features
            pl.BlockSpec((tile_m, tile_k), lambda m, k: (m, k)),  # fat K blocks of adj
        ]
        out_specs = pl.BlockSpec((h, tile_m), lambda m, k: (0, m))
        scratch = [pltpu.VMEM((h, tile_m), jnp.float32)]
        dims = ("parallel", "arbitrary")

    return pl.pallas_call(
        kernel,
        out_shape=out_shape,
        grid_spec=pltpu.PrefetchScalarGridSpec(
            num_scalar_prefetch=0,
            grid=grid,
            in_specs=in_specs,
            out_specs=out_specs,
            scratch_shapes=scratch,
        ),
        compiler_params=pltpu.CompilerParams(
            dimension_semantics=dims,
            vmem_limit_bytes=_vmem_limit(tile_m, tile_k, n_pad, h, k_steps),
        ),
    )(feat_t, adj_p)


def gcn_forward(x, adj, w1, w2, *, block_m=1024, tile_k_max=4096):
    """GCN eval forward: squeeze( adj @ relu(adj @ (x @ W1)) @ W2 )."""
    N = adj.shape[0]
    nhid = w1.shape[1]
    h_pad = _round_up(max(nhid, 8), 8)

    # Tile selection: collapse K whenever a (tile_m, n_pad) adj slab fits budget.
    tile_m = min(block_m, _round_up(N, 128))
    if _round_up(N, tile_m) <= tile_k_max:
        n_pad = _round_up(N, tile_m)
        tile_k = n_pad                       # full-N reduction in a single block
    else:
        tile_k = _round_up(tile_k_max, tile_m)
        n_pad = _round_up(N, tile_k)

    # Pad + cast adj to bf16 exactly once; reused by BOTH aggregation layers.
    adj_p = jnp.pad(adj, ((0, n_pad - N), (0, n_pad - N))).astype(jnp.bfloat16)

    # Layer-1 feature projection (cheap [F,H] matmul) in XLA, kept transposed
    # ([H, N]) so N is the lane axis for everything downstream.
    xw1_t = jnp.dot(
        w1.T.astype(jnp.bfloat16), x.T.astype(jnp.bfloat16),
        preferred_element_type=jnp.float32,
    )
    xw1_t = jnp.pad(xw1_t, ((0, h_pad - nhid), (0, n_pad - N))).astype(jnp.bfloat16)

    # gc1: relu(adj @ (x @ W1)), transposed -> [h_pad, n_pad], emitted as bf16.
    h_t = gcn_aggregate_t(adj_p, xw1_t, apply_relu=True,
                          tile_m=tile_m, tile_k=tile_k, out_dtype=jnp.bfloat16)
    # TODO(synk): training-mode dropout (F.dropout) not implemented; eval semantics only.
    # gc2: adj @ (h @ W2) == ((adj @ h) @ W2): keep the H-wide adj@h in-kernel,
    # apply the width-1 W2 projection outside on the lane-dense [H, N] result.
    g_t = gcn_aggregate_t(adj_p, h_t, apply_relu=False,
                          tile_m=tile_m, tile_k=tile_k, out_dtype=jnp.float32)

    w2_p = jnp.pad(w2.astype(jnp.float32), ((0, h_pad - w2.shape[0]), (0, 0)))
    out = jnp.dot(w2_p.T, g_t, preferred_element_type=jnp.float32)  # [1, n_pad]
    return out[0, :N]   # matches torch .squeeze() on [N, 1] -> [N]


def xavier_uniform(key, fan_in, fan_out):
    bound = jnp.sqrt(6.0 / (fan_in + fan_out))
    return jax.random.uniform(
        key, (fan_in, fan_out), dtype=jnp.float32, minval=-bound, maxval=bound
    )


if __name__ == "__main__":
    # N=200 -> padded to 256: with block_m=128 there are 2 parallel row tiles.
    N, NFEAT, NHID = 200, 16, 8
    key = jax.random.PRNGKey(0)
    kx, kadj, kw1, kw2 = jax.random.split(key, 4)

    x = jax.random.normal(kx, (N, NFEAT), dtype=jnp.float32)

    # Symmetric, row-normalized adjacency (typical GCN preprocessing).
    a = (jax.random.uniform(kadj, (N, N)) < 0.2).astype(jnp.float32)
    a = jnp.maximum(a, a.T) + jnp.eye(N, dtype=jnp.float32)
    adj = a / jnp.sum(a, axis=1, keepdims=True)

    w1 = xavier_uniform(kw1, NFEAT, NHID)
    w2 = xavier_uniform(kw2, NHID, 1)

    # Reference in plain f32 JAX (eval mode: dropout is identity). Tolerance
    # loosened because the kernel uses bf16 matmul operands (f32 accumulation).
    ref = (adj @ jnp.maximum(adj @ (x @ w1), 0.0) @ w2).squeeze(-1)

    # Path 1: collapsed-K (grid over row tiles only, no accumulator scratch).
    out = gcn_forward(x, adj, w1, w2, block_m=128)
    jax.block_until_ready(out)
    assert out.shape == (N,)
    assert jnp.allclose(out, ref, atol=2e-2, rtol=2e-2), float(
        jnp.max(jnp.abs(out - ref)))

    # Path 2: split-K accumulator path (grid (rows, k_steps) with pl.when init/finalize).
    out2 = gcn_forward(x, adj, w1, w2, block_m=128, tile_k_max=128)
    jax.block_until_ready(out2)
    assert jnp.allclose(out2, ref, atol=2e-2, rtol=2e-2), float(
        jnp.max(jnp.abs(out2 - ref)))

    print("KERNEL_OK")
</pallas_src>

<mosaic_0001>
module attributes {stable_mosaic.version = 11 : i64} {
  func.func @_agg_t_kernel(%arg0: i32, %arg1: memref<8x256xbf16, #tpu.memory_space<vmem>>, %arg2: memref<128x256xbf16, #tpu.memory_space<vmem>>, %arg3: memref<8x128xbf16, #tpu.memory_space<vmem>>) attributes {dimension_semantics = [#tpu.dimension_semantics<parallel>], iteration_bounds = array<i64: 2>, scalar_prefetch = 0 : i64, scratch_operands = 0 : i64, tpu.core_type = #tpu.core_type<tc>, window_params = [{pipeline_mode = #tpu.pipeline_mode<synchronous>, transform_indices = @transform_0, window_bounds = array<i64: 8, 256>}, {transform_indices = @transform_1, window_bounds = array<i64: 128, 256>}, {transform_indices = @transform_2, window_bounds = array<i64: 8, 128>}]} {
    %c0 = arith.constant 0 : index
    %c0_0 = arith.constant 0 : index
    %0 = vector.load %arg1[%c0, %c0_0] : memref<8x256xbf16, #tpu.memory_space<vmem>>, vector<8x256xbf16>
    %c0_1 = arith.constant 0 : index
    %c0_2 = arith.constant 0 : index
    %1 = vector.load %arg2[%c0_1, %c0_2] : memref<128x256xbf16, #tpu.memory_space<vmem>>, vector<128x256xbf16>
    %cst = arith.constant dense<0.000000e+00> : vector<8x128xf32>
    %2 = tpu.matmul %0, %1, %cst {dimension_numbers = #tpu.dot_dimension_numbers<[1], [1], [0], [0], [0, 0, 1, 0], [], []>} : vector<8x256xbf16>, vector<128x256xbf16>, vector<8x128xf32> -> vector<8x128xf32>
    %cst_3 = arith.constant 0.000000e+00 : f32
    %3 = vector.broadcast %cst_3 : f32 to vector<8x128xf32>
    %4 = arith.maximumf %2, %3 : vector<8x128xf32>
    %5 = arith.truncf %4 : vector<8x128xf32> to vector<8x128xbf16>
    %c0_4 = arith.constant 0 : index
    %c0_5 = arith.constant 0 : index
    %6 = vector.load %arg3[%c0_4, %c0_5] : memref<8x128xbf16, #tpu.memory_space<vmem>>, vector<8x128xbf16>
    tpu.vector_store %arg3[%c0_4, %c0_5], %5 {strides = array<i32>} : memref<8x128xbf16, #tpu.memory_space<vmem>>, vector<8x128xbf16>,
    return
  }
  func.func @transform_0(%arg0: i32) -> (i32, i32) {
    %c0_i32 = arith.constant 0 : i32
    %c0_i32_0 = arith.constant 0 : i32
    %c0_i32_1 = arith.constant 0 : i32
    return %c0_i32, %c0_i32_0 : i32, i32
  }
  func.func @transform_1(%arg0: i32) -> (i32, i32) {
    %c0_i32 = arith.constant 0 : i32
    %c0_i32_0 = arith.constant 0 : i32
    return %arg0, %c0_i32 : i32, i32
  }
  func.func @transform_2(%arg0: i32) -> (i32, i32) {
    %c0_i32 = arith.constant 0 : i32
    %c0_i32_0 = arith.constant 0 : i32
    return %c0_i32, %arg0 : i32, i32
  }
}

</mosaic_0001>

<bundles_post_ra>
// kernel: tpu_custom_call.1
= control target key start
LH: loop header
LB: loop body
LE: loop exit
PB: predicated region body
PF: predicated region fallthrough
CT: control target
= control target key end

     0   :  { %7 = vsyncpa [#allocation3], 0  ;;  %s896_s0 = inlined_call_operand.hbm [shape: bf16[8,256], index: 0, kind: input, shape index: {}]   ;;  %s897_s1 = inlined_call_operand.hbm [shape: bf16[256,256], index: 1, kind: input, shape index: {}]   ;;  %s898_s2 = inlined_call_operand.hbm [shape: bf16[8,256], index: 2, kind: output, shape index: {}]  }
   0x1   :  { %8 = vsyncpa [#allocation6], 0 }
   0x2   :  { %10 = vsyncpa [#allocation6 + $0x1], 0 }
   0x3   :  { %11 = vsyncpa [#allocation4], 0 }
   0x4   :  { %13 = vsyncpa [#allocation4 + $0x1], 0  ;;  %s719_s9 = smov 0   ;;  %s721_s10 = smov 0  }
   0x5   :  { %s723_s11 = smov 0   ;;  %s725_s12 = smov 0  }
   0x6 LB: > { %s740_s13 = sadd.s32 4294967295, %s699_s12   ;;  %s412_s14 = sadd.s32 4294967294, %s699_s12   ;;  %s699_s12 = sphi %s725_s12, %s909_s12   ;;  %s695_s11 = sphi %s723_s11, %s908_s11   ;;  %s691_s10 = sphi %s721_s10, %s907_s10   ;;  %s687_s9 = sphi %s719_s9, %s906_s9  }
   0x7   : > { %s744_s15 = sadd.s32 1, %s699_s12   ;;  %s47_s16 = sadd.s32 1, %s695_s11 }
   0x8   : > { %s44_s17 = ssub.s32 %s699_s12, %s744_s15  ;;  %p54_p0 = scmp.ne.s32.totalorder %s695_s11, %s691_s10 }
   0x9   : > { %p45_p1 = scmp.eq.s32.totalorder %s44_s17, 0  ;;  %p55_p2 = scmp.eq.s32.totalorder %s699_s12, 0 }
   0xa   : > { %p60_p3 = scmp.ne.s32.totalorder %s691_s10, %s687_s9  ;;  %p61_p4 = scmp.eq.s32.totalorder %s740_s13, 0 }
   0xb   : > { %s756_s18 = scalar_select %p45_p1, %s695_s11, %s47_s16  }
   0xc   : > { %p758_p5 = por %p55_p2, %p54_p0  ;;  %p764_p6 = por %p61_p4, %p60_p3 }
   0xd   : > { %p84_p7 = scmp.eq.s32.totalorder %s740_s13, 1  ;;  %p90_p8 = scmp.eq.s32.totalorder %s412_s14, 1 }
   0xe   : > { %p413_p9 = scmp.ge.s32.totalorder %s699_s12, 1  ;;  %p97_p10 = scmp.lt.s32.totalorder %s699_s12, 3 }
   0xf   : > { %p771_p11 = por %p84_p7, %p54_p0  ;;  %p775_p12 = por %p90_p8, %p60_p3 }
  0x10   : > { %p779_p13 = pnand %p413_p9, %p97_p10  ;;  %s109_s26 = sshll.u32 %s896_s0, 4  ;;  %s110_s26 = int_to_ptr.hbm [resolvable:$true] %s109_s26 }
  0x11   : > { %s701_s27 = smov [#allocation2]   ;;  %p531_p3 = scmp.lt.s32.totalorder %s699_s12, 2 }
  0x12   : > { %p518_p1 = pneg %p779_p13  ;;  %s111_s28 = sshll.u32 %s701_s27, 4  ;;  %s112_s28 = int_to_ptr.vmem [resolvable:$true] %s111_s28 }
  0x13   : > { %s122_s29 = sand.u32 1, %s695_s11   ;;  %p795_p7 = pnand %p531_p3, %p758_p5 }
  0x14   : > { %p519_p2 = pnand %p518_p1, %p61_p4  ;;  %s416_s3 = sshll.u32 %s122_s29, 7 }
  0x15   : > { %s493_s4 = sshll.u32 %s699_s12, 7  ;;  %s126_s14 = scalar_lea.vmem [#allocation5], %s416_s3 }
  0x16   : > { %521 = dma.hbm_to_vmem [thread:$0]  (!%p519_p2), %s110_s26, 128, %s112_s28, [#allocation3]  }
  0x17   : > { %s132_s7 = scalar_lea.hbm %s897_s1, %s493_s4  ;;  %s135_s16 = sshll.u32 %s126_s14, 4  ;;  %s136_s16 = int_to_ptr.vmem [resolvable:$true] %s135_s16 }
  0x18   : > { %s133_s8 = sshll.u32 %s132_s7, 4  ;;  %s123_s17 = scalar_lea.sflag [#allocation6], %s122_s29  ;;  %s134_s8 = int_to_ptr.hbm [resolvable:$true] %s133_s8 }
  0x19   : > { %s599_s24 = sshra.s32 %s134_s8, 4  ;;  %p603_p8 = pneg %p795_p7  ;;  %s600_s24 = int_to_ptr.hbm [resolvable:$true] %s599_s24 }
  0x1a   : > { %s601_s19 = scalar_lea.hbm %s600_s24, 128  ;;  %s606_s27 = scalar_lea.hbm %s897_s1, 256 }
  0x1b   : > { %p602_p5 = scmp.ne.s32.totalorder %s600_s24, %s601_s19  ;;  %p607_p1 = scmp.lt.s32.totalorder %s600_s24, %s897_s1 }
  0x1c   : > { %p608_p2 = scmp.lt.s32.totalorder %s606_s27, %s601_s19 }
  0x1d   : > { %p604_p9 = pnand %p603_p8, %p602_p5 }
  0x1e   : > { %p609_p3 = por %p608_p2, %p607_p1 }
  0x1f   : > { %p605_p10 = pneg %p604_p9 }
  0x21   : > { %p610_p0 = pnand %p609_p3, %p605_p10 }
  0x23   : > { %613 = shalt.err (!%p610_p0)
}
  0x24   : > { %s702_s29 = smov 128   ;;  %s703_s3 = smov 8  }
  0x25   : > { %525 = dma.hbm_to_vmem [thread:$0]  (!%p795_p7), %s134_s8, 2048, %s136_s16, %s123_s17, %s702_s29, %s702_s29, %s703_s3  }
  0x26   : > { %147 = sbr.rel (%p779_p13) target bundleno = 251 (0xfb), region = 28 }
  0x2b   : > { %674 = dma.done.wait (%p61_p4), [#allocation3], 128  }
  0x2c   : > { %676 = vsyncadd (%p61_p4), [#allocation3], 4294967168  ;;  %s820_s5 = sand.u32 1, %s691_s10  }
  0x2d   : > { %s422_s6 = sshll.u32 %s820_s5, 7  ;;  %s155_s7 = scalar_lea.sflag [#allocation6], %s820_s5 }
  0x2e   : > { %s824_s14 = scalar_lea.vmem [#allocation5], %s422_s6 }
  0x2f   : > { %678 = dma.done.wait (%p764_p6), %s155_s7, 2048  }
  0x30   : > { %680 = vsyncadd (%p764_p6), %s155_s7, 4294965248  ;;  %v482_v0 = vld [vmem:[%s824_s14 + $0x70] sm:$0xf]  ;;  %v509_v1 = vld [vmem:[%s824_s14 + $0x74] sm:$0xf0]  ;;  %s423_s20 = sshll.u32 %s820_s5, 2 }
  0x31   : > { %v508_v2 = vld [vmem:[%s824_s14 + $0x74] sm:$0xf]  ;;  %v483_v3 = vor.u32 %v509_v1, %v482_v0  ;;  %v484_v4 = vld [vmem:[%s824_s14 + $0x78] sm:$0xf0]  ;;  %v474_v6 = vld [vmem:[%s824_s14 + $0x60] sm:$0xf] }
  0x32   : > { %v487_v5 = vor.u32 %v508_v2, %v484_v4  ;;  %v507_v7 = vld [vmem:[%s824_s14 + $0x64] sm:$0xf0]  ;;  %v506_v8 = vld [vmem:[%s824_s14 + $0x64] sm:$0xf]  ;;  %v476_v9 = vld [vmem:[%s824_s14 + $0x68] sm:$0xf0] }
  0x33   : > { %285 = vmatpush.bf16.xpose.msra.mxu0 %v483_v3  ;;  %v475_v10 = vor.u32 %v507_v7, %v474_v6  ;;  %v479_v11 = vor.u32 %v506_v8, %v476_v9  ;;  %v466_v12 = vld [vmem:[%s824_s14 + $0x50] sm:$0xf]  ;;  %v505_v13 = vld [vmem:[%s824_s14 + $0x54] sm:$0xf0]  ;;  %v504_v14 = vld [vmem:[%s824_s14 + $0x54] sm:$0xf] }
  0x34   : > { %298 = vmatpush.bf16.xpose.msra.mxu1 %v487_v5  ;;  %v468_v15 = vld [vmem:[%s824_s14 + $0x58] sm:$0xf0]  ;;  %v467_v16 = vor.u32 %v505_v13, %v466_v12  ;;  %v458_v18 = vld [vmem:[%s824_s14 + $0x40] sm:$0xf]  ;;  %v503_v19 = vld [vmem:[%s824_s14 + $0x44] sm:$0xf0] }
  0x35   : > { %v471_v17 = vor.u32 %v504_v14, %v468_v15  ;;  %v502_v20 = vld [vmem:[%s824_s14 + $0x44] sm:$0xf]  ;;  %v460_v21 = vld [vmem:[%s824_s14 + $0x48] sm:$0xf0]  ;;  %v459_v22 = vor.u32 %v503_v19, %v458_v18  ;;  %v450_v24 = vld [vmem:[%s824_s14 + $0x30] sm:$0xf] }
  0x36   : > { %v463_v23 = vor.u32 %v502_v20, %v460_v21  ;;  %v501_v25 = vld [vmem:[%s824_s14 + $0x34] sm:$0xf0]  ;;  %v500_v26 = vld [vmem:[%s824_s14 + $0x34] sm:$0xf]  ;;  %v452_v27 = vld [vmem:[%s824_s14 + $0x38] sm:$0xf0] }
  0x37   : > { %v451_v28 = vor.u32 %v501_v25, %v450_v24  ;;  %v455_v29 = vor.u32 %v500_v26, %v452_v27  ;;  %v442_v30 = vld [vmem:[%s824_s14 + $0x20] sm:$0xf]  ;;  %v499_v31 = vld [vmem:[%s824_s14 + $0x24] sm:$0xf0]  ;;  %v498_v32 = vld [vmem:[%s824_s14 + $0x24] sm:$0xf] }
  0x38   : > { %v444_v33 = vld [vmem:[%s824_s14 + $0x28] sm:$0xf0]  ;;  %v443_v34 = vor.u32 %v499_v31, %v442_v30  ;;  %v434_v36 = vld [vmem:[%s824_s14 + $0x10] sm:$0xf]  ;;  %v497_v37 = vld [vmem:[%s824_s14 + $0x14] sm:$0xf0] }
  0x39   : > { %v447_v35 = vor.u32 %v498_v32, %v444_v33  ;;  %v496_v38 = vld [vmem:[%s824_s14 + $0x14] sm:$0xf]  ;;  %v436_v39 = vld [vmem:[%s824_s14 + $0x18] sm:$0xf0]  ;;  %v435_v40 = vor.u32 %v497_v37, %v434_v36  ;;  %v426_v42 = vld [vmem:[%s824_s14] sm:$0xf] }
  0x3a   : > { %v439_v41 = vor.u32 %v496_v38, %v436_v39  ;;  %v495_v43 = vld [vmem:[%s824_s14 + $0x4] sm:$0xf0]  ;;  %v494_v44 = vld [vmem:[%s824_s14 + $0x4] sm:$0xf]  ;;  %v428_v45 = vld [vmem:[%s824_s14 + $0x8] sm:$0xf0] }
  0x3b   : > { %286 = vmatpush.bf16.xpose.msra.mxu0 %v475_v10  ;;  %v427_v46 = vor.u32 %v495_v43, %v426_v42  ;;  %v181_v47 = vld [vmem:[#allocation2] sm:$0xff]  ;;  %v431_v48 = vor.u32 %v494_v44, %v428_v45  ;;  %s489_s23 = sshll.u32 %s740_s13, 2  ;;  %s179_s17 = scalar_lea.vmem [#allocation7], %s423_s20 }
  0x3c   : > { %299 = vmatpush.bf16.xpose.msra.mxu1 %v479_v11  ;;  %v199_v49 = vunpack.c.l.b16 %v181_v47  ;;  %v200_v50 = vunpack.c.h.b16 %v181_v47  ;;  %s325_s16 = scalar_lea.hbm %s898_s2, %s489_s23  ;;  %s327_s24 = sshll.u32 %s179_s17, 4  ;;  %s328_s24 = int_to_ptr.vmem [resolvable:$true] %s327_s24 }
  0x3d   : > { %s329_s19 = sshll.u32 %s325_s16, 4  ;;  %s315_s25 = scalar_lea.sflag [#allocation4], %s820_s5  ;;  %s330_s19 = int_to_ptr.hbm [resolvable:$true] %s329_s19 }
  0x3e   : > { %v201_v51 = vpack.c.b16 %v199_v49, %v199_v49  ;;  %v202_v52 = vpack.c.b16 %v200_v50, %v200_v50  ;;  %s643_s13 = sshra.s32 %s330_s19, 4  ;;  %s649_s4 = scalar_lea.hbm %s898_s2, 8  ;;  %s644_s13 = int_to_ptr.hbm [resolvable:$true] %s643_s13 }
  0x3f   : > { %s645_s26 = scalar_lea.hbm %s644_s13, 4  ;;  %p650_p0 = scmp.lt.s32.totalorder %s644_s13, %s898_s2 }
  0x40   : > { %p646_p4 = scmp.ne.s32.totalorder %s644_s13, %s645_s26  ;;  %p651_p7 = scmp.lt.s32.totalorder %s649_s4, %s645_s26 }
  0x42   : > { %p647_p6 = pnand %p646_p4, %p771_p11  ;;  %p652_p5 = por %p651_p7, %p650_p0 }
  0x43   : > { %287 = vmatpush.bf16.xpose.msra.mxu0 %v467_v16 }
  0x44   : > { %300 = vmatpush.bf16.xpose.msra.mxu1 %v471_v17  ;;  %p648_p13 = pneg %p647_p6 }
  0x46   : > { %p653_p8 = pnand %p652_p5, %p648_p13 }
  0x4b   : > { %288 = vmatpush.bf16.xpose.msra.mxu0 %v459_v22 }
  0x4c   : > { %301 = vmatpush.bf16.xpose.msra.mxu1 %v463_v23 }
  0x53   : > { %289 = vmatpush.bf16.xpose.msra.mxu0 %v451_v28 }
  0x54   : > { %302 = vmatpush.bf16.xpose.msra.mxu1 %v455_v29 }
  0x5b   : > { %290 = vmatpush.bf16.xpose.msra.mxu0 %v443_v34 }
  0x5c   : > { %303 = vmatpush.bf16.xpose.msra.mxu1 %v447_v35 }
  0x63   : > { %291 = vmatpush.bf16.xpose.msra.mxu0 %v435_v40 }
  0x64   : > { %304 = vmatpush.bf16.xpose.msra.mxu1 %v439_v41 }
  0x6b   : > { %292 = vmatpush.bf16.xpose.msra.mxu0 %v427_v46 }
  0x6c   : > { %305 = vmatpush.bf16.xpose.msra.mxu1 %v431_v48 }
  0x72   : > { %293 = vmatmul.bf16.vlgmr.msra.gmra.mxu0 %v201_v51 }
  0x73   : > { %306 = vmatmul.bf16.vlgmr.msra.gmra.mxu1 %v202_v52 }
  0xef   : > { %v294_v53 = vpop.f32.mrf.mxu0 }
  0xf0   : > { %v307_v54 = vpop.f32.mrf.mxu1 }
  0xf1   : > { %v308_v55 = vadd.f32 %v307_v54, %v294_v53 }
  0xf3   : > { %v311_v56 = vmax.f32 %v308_v55, 0.0 }
  0xf5   : > { %v312_v57 = vpack.c.bf16 %v311_v56, %v311_v56 }
  0xf7   : > { %v296_v58 = vpop.f32.mrf.mxu0  ;;  %313 = vst [vmem:[%s179_s17] sm:$0xf] %v312_v57 }
  0xf8   : > { %v309_v59 = vpop.f32.mrf.mxu1 }
  0xf9   : > { %656 = shalt.err (!%p653_p8)
}
  0xfa   : > { %516 = dma.vmem_to_hbm [thread:$0]  (%p771_p11), %s328_s24, 64, %s330_s19, %s315_s25  }
  0xfb PF: > { %s341_s5 = sand.u32 1, %s687_s9   ;;  %p905_p9 = scmp.ge.s32.totalorder %s699_s12, 2 }
  0xfc   : > { %s342_s6 = scalar_lea.sflag [#allocation4], %s341_s5 }
  0xfd   : > { %p527_p10 = pnand %p905_p9, %p775_p12 }
  0xff   : > { %p528_p1 = pneg %p527_p10 }
 0x101   : > { %682 = dma.done.wait (%p528_p1), %s342_s6, 64  }
 0x102   : > { %684 = vsyncadd (%p528_p1), %s342_s6, 4294967232  ;;  %p16_p2 = scmp.ge.s32.totalorder %s744_s15, 4   ;;  %s906_s9 = smov %s691_s10 }
 0x103   : > { %s907_s10 = smov %s695_s11  ;;  %s908_s11 = smov %s756_s18 }
 0x104   : > { %s909_s12 = smov %s744_s15  ;;  %18 = sbr.rel (!%p16_p2) target bundleno = 6 (0x6), region = 78 }
 0x109   :  { %348 = vsyncpa [#allocation3], 1 }
 0x10a   :  { %350 = vsyncpa [#allocation3 + $0x1], 1 }
 0x10b   :  { %351 = vsyncpa [#allocation6], 1 }
 0x10c   :  { %353 = vsyncpa [#allocation6 + $0x1], 1 }
 0x10d   :  { %354 = vsyncpa [#allocation4], 1 }
 0x10e   :  { %356 = vsyncpa [#allocation4 + $0x1], 1 }

</bundles_post_ra>
